<compile_context>
chip_gen: v7x
topology: tpu7x:2x2x1
jax: 0.10.0
libtpu: 0.0.40
codegen_flags: <defaults>
</compile_context>

<pallas_src>
import math

import jax
import jax.numpy as jnp
from jax.experimental import pallas as pl
from jax.experimental.pallas import tpu as pltpu

LANE = 128


def _round_up(x, m):
    return ((x + m - 1) // m) * m


def _choose_tiles(n_pad):
    """Pick (TM, TK) that divide n_pad (n_pad is a multiple of 128)."""
    tm = 256 if n_pad % 256 == 0 else 128
    if n_pad % 512 == 0:
        tk = 512
    elif n_pad % 256 == 0:
        tk = 256
    else:
        tk = 128
    return tm, tk


# --------------------------------------------------------------------------- #
# Kernels
# --------------------------------------------------------------------------- #
def _gcn_fused_kernel(adj_ref, x_ref, w_ref, out_ref, acc_ref):
    """out_tile = (sum_k adj[i,k] @ x[k]) @ W, accumulated over the K grid axis."""
    k = pl.program_id(2)

    @pl.when(k == 0)
    def _():
        acc_ref[...] = jnp.zeros_like(acc_ref)

    acc_ref[...] += jnp.dot(
        adj_ref[0], x_ref[0], preferred_element_type=jnp.float32
    )

    @pl.when(k == pl.num_programs(2) - 1)
    def _():
        out_ref[0] = jnp.dot(
            acc_ref[...].astype(w_ref.dtype),
            w_ref[...],
            preferred_element_type=jnp.float32,
        ).astype(out_ref.dtype)


def _support_kernel(x_ref, w_ref, out_ref):
    """support_tile = x_tile @ W."""
    out_ref[0] = jnp.dot(
        x_ref[0], w_ref[...], preferred_element_type=jnp.float32
    ).astype(out_ref.dtype)


def _agg_kernel(adj_ref, s_ref, out_ref, acc_ref):
    """out_tile = sum_k adj[i,k] @ support[k], accumulated over the K grid axis."""
    k = pl.program_id(2)

    @pl.when(k == 0)
    def _():
        acc_ref[...] = jnp.zeros_like(acc_ref)

    acc_ref[...] += jnp.dot(
        adj_ref[0], s_ref[0], preferred_element_type=jnp.float32
    )

    @pl.when(k == pl.num_programs(2) - 1)
    def _():
        out_ref[0] = acc_ref[...].astype(out_ref.dtype)


# --------------------------------------------------------------------------- #
# Wrapper
# --------------------------------------------------------------------------- #
def graph_convolution3(x, adj, weight, *, compute_dtype=None):
    """x: [B, N, F_in], adj: [B, N, N], weight: [F_in, F_out] -> [B, N, F_out].

    compute_dtype: dtype fed to the MXU (e.g. jnp.bfloat16 on v6e/v7x).
                   Accumulation is always float32.
    """
    B, N, F_in = x.shape
    F_out = weight.shape[1]
    out_dtype = x.dtype
    cdt = compute_dtype if compute_dtype is not None else x.dtype

    # Pad features to lane width and N to a tile-friendly multiple (zero padding
    # is exact: padded x rows / adj rows+cols are zero, extra output is sliced).
    F_in_p = _round_up(F_in, LANE)
    F_out_p = _round_up(F_out, LANE)
    N_p = _round_up(N, LANE)
    TM, TK = _choose_tiles(N_p)

    x_p = jnp.zeros((B, N_p, F_in_p), cdt).at[:, :N, :F_in].set(x.astype(cdt))
    adj_p = jnp.zeros((B, N_p, N_p), cdt).at[:, :N, :N].set(adj.astype(cdt))
    w_p = jnp.zeros((F_in_p, F_out_p), cdt).at[:F_in, :F_out].set(weight.astype(cdt))

    grid = (B, N_p // TM, N_p // TK)
    itemsize = jnp.dtype(cdt).itemsize
    out_bytes = B * N_p * F_out_p * jnp.dtype(out_dtype).itemsize

    if F_in_p <= F_out_p:
        # Fused single pass: out = (adj @ x) @ W.  Dominant N^2 term uses F_in_p.
        cost = pl.CostEstimate(
            flops=int(2 * B * (N_p * N_p * F_in_p + N_p * F_in_p * F_out_p)),
            transcendentals=0,
            bytes_accessed=int(
                (x_p.size + adj_p.size + w_p.size) * itemsize + out_bytes
            ),
        )
        out_p = pl.pallas_call(
            _gcn_fused_kernel,
            out_shape=jax.ShapeDtypeStruct((B, N_p, F_out_p), out_dtype),
            grid_spec=pltpu.PrefetchScalarGridSpec(
                num_scalar_prefetch=0,
                grid=grid,
                in_specs=[
                    pl.BlockSpec((1, TM, TK), lambda b, i, k: (b, i, k)),
                    pl.BlockSpec((1, TK, F_in_p), lambda b, i, k: (b, k, 0)),
                    # Constant index_map -> W stays resident in VMEM.
                    pl.BlockSpec((F_in_p, F_out_p), lambda b, i, k: (0, 0)),
                ],
                out_specs=pl.BlockSpec((1, TM, F_out_p), lambda b, i, k: (b, i, 0)),
                scratch_shapes=[pltpu.VMEM((TM, F_in_p), jnp.float32)],
            ),
            compiler_params=pltpu.CompilerParams(
                dimension_semantics=("parallel", "parallel", "arbitrary"),
            ),
            cost_estimate=cost,
        )(adj_p, x_p, w_p)
    else:
        # Two stage: support = x @ W (cheap, hoisted), then out = adj @ support.
        support = pl.pallas_call(
            _support_kernel,
            out_shape=jax.ShapeDtypeStruct((B, N_p, F_out_p), cdt),
            grid_spec=pltpu.PrefetchScalarGridSpec(
                num_scalar_prefetch=0,
                grid=(B, N_p // TM),
                in_specs=[
                    pl.BlockSpec((1, TM, F_in_p), lambda b, i: (b, i, 0)),
                    pl.BlockSpec((F_in_p, F_out_p), lambda b, i: (0, 0)),
                ],
                out_specs=pl.BlockSpec((1, TM, F_out_p), lambda b, i: (b, i, 0)),
            ),
            compiler_params=pltpu.CompilerParams(
                dimension_semantics=("parallel", "parallel"),
            ),
        )(x_p, w_p)

        cost = pl.CostEstimate(
            flops=int(2 * B * N_p * N_p * F_out_p),
            transcendentals=0,
            bytes_accessed=int(
                (adj_p.size + support.size) * itemsize + out_bytes
            ),
        )
        out_p = pl.pallas_call(
            _agg_kernel,
            out_shape=jax.ShapeDtypeStruct((B, N_p, F_out_p), out_dtype),
            grid_spec=pltpu.PrefetchScalarGridSpec(
                num_scalar_prefetch=0,
                grid=grid,
                in_specs=[
                    pl.BlockSpec((1, TM, TK), lambda b, i, k: (b, i, k)),
                    pl.BlockSpec((1, TK, F_out_p), lambda b, i, k: (b, k, 0)),
                ],
                out_specs=pl.BlockSpec((1, TM, F_out_p), lambda b, i, k: (b, i, 0)),
                scratch_shapes=[pltpu.VMEM((TM, F_out_p), jnp.float32)],
            ),
            compiler_params=pltpu.CompilerParams(
                dimension_semantics=("parallel", "parallel", "arbitrary"),
            ),
            cost_estimate=cost,
        )(adj_p, support)

    return out_p[:, :N, :F_out]


def init_params(key, in_features, out_features):
    # Matches PyTorch reset_parameters(): uniform(-stdv, stdv), stdv = 1/sqrt(out_features)
    stdv = 1.0 / math.sqrt(out_features)
    k_w, k_b = jax.random.split(key)
    weight = jax.random.uniform(
        k_w, (in_features, out_features), jnp.float32, minval=-stdv, maxval=stdv
    )
    bias = jax.random.uniform(
        k_b, (out_features,), jnp.float32, minval=-stdv, maxval=stdv
    )  # declared in the module but unused in forward
    return weight, bias


if __name__ == "__main__":
    key = jax.random.PRNGKey(0)
    k_x, k_adj, k_p, k_x2, k_adj2, k_p2 = jax.random.split(key, 6)

    # ----- test 1: module-sized shapes (fused (adj@x)@W path), f32 -----
    B, N = 2, 16
    in_features, out_features = 8, 32
    x = jax.random.normal(k_x, (B, N, in_features), jnp.float32)
    adj = jax.random.uniform(k_adj, (B, N, N), jnp.float32)
    weight, _bias = init_params(k_p, in_features, out_features)

    out = jax.block_until_ready(graph_convolution3(x, adj, weight))
    ref = jnp.matmul(adj, jnp.matmul(x, weight))
    assert out.shape == (B, N, out_features)
    assert jnp.allclose(out, ref, atol=1e-4, rtol=1e-4)

    # ----- test 2: wide-input shapes (two-stage adj@(x@W) path), f32 -----
    in2, out2 = 160, 32
    x2 = jax.random.normal(k_x2, (B, N, in2), jnp.float32)
    adj2 = jax.random.uniform(k_adj2, (B, N, N), jnp.float32)
    w2, _ = init_params(k_p2, in2, out2)
    o2 = jax.block_until_ready(graph_convolution3(x2, adj2, w2))
    r2 = jnp.matmul(adj2, jnp.matmul(x2, w2))
    assert o2.shape == (B, N, out2)
    assert jnp.allclose(o2, r2, atol=1e-4, rtol=1e-4)

    # ----- test 3: bf16 MXU inputs with f32 accumulation (v6e/v7x style) -----
    o3 = jax.block_until_ready(
        graph_convolution3(x, adj, weight, compute_dtype=jnp.bfloat16)
    )
    assert jnp.allclose(o3, ref, atol=1e-1, rtol=1e-1)

    print("KERNEL_OK")
</pallas_src>

<mosaic_0001>
module attributes {stable_mosaic.version = 11 : i64} {
  func.func @_gcn_fused_kernel(%arg0: i32, %arg1: i32, %arg2: i32, %arg3: memref<1x128x128xf32, #tpu.memory_space<vmem>>, %arg4: memref<1x128x128xf32, #tpu.memory_space<vmem>>, %arg5: memref<128x128xf32, #tpu.memory_space<vmem>>, %arg6: memref<1x128x128xf32, #tpu.memory_space<vmem>>, %arg7: memref<128x128xf32, #tpu.memory_space<vmem>>) attributes {dimension_semantics = [#tpu.dimension_semantics<parallel>, #tpu.dimension_semantics<parallel>, #tpu.dimension_semantics<arbitrary>], iteration_bounds = array<i64: 2, 1, 1>, scalar_prefetch = 0 : i64, scratch_operands = 1 : i64, tpu.core_type = #tpu.core_type<tc>, window_params = [{transform_indices = @transform_0, window_bounds = array<i64: 1, 128, 128>}, {transform_indices = @transform_1, window_bounds = array<i64: 1, 128, 128>}, {pipeline_mode = #tpu.pipeline_mode<synchronous>, transform_indices = @transform_2, window_bounds = array<i64: 128, 128>}, {transform_indices = @transform_3, window_bounds = array<i64: 1, 128, 128>}]} {
    %c0_i32 = arith.constant 0 : i32
    %0 = arith.cmpi eq, %arg2, %c0_i32 : i32
    %1 = arith.extui %0 : i1 to i32
    %c0_i32_0 = arith.constant 0 : i32
    %2 = arith.cmpi ne, %1, %c0_i32_0 : i32
    scf.if %2 {
      %cst_12 = arith.constant 0.000000e+00 : f32
      %14 = vector.broadcast %cst_12 : f32 to vector<128x128xf32>
      %c0_13 = arith.constant 0 : index
      %c0_14 = arith.constant 0 : index
      %15 = vector.load %arg7[%c0_13, %c0_14] : memref<128x128xf32, #tpu.memory_space<vmem>>, vector<128x128xf32>
      tpu.vector_store %arg7[%c0_13, %c0_14], %14 {strides = array<i32>} : memref<128x128xf32, #tpu.memory_space<vmem>>, vector<128x128xf32>,
    } else {
    }
    %c0 = arith.constant 0 : index
    %c0_1 = arith.constant 0 : index
    %3 = vector.load %arg7[%c0, %c0_1] : memref<128x128xf32, #tpu.memory_space<vmem>>, vector<128x128xf32>
    %c0_2 = arith.constant 0 : index
    %c0_3 = arith.constant 0 : index
    %c0_4 = arith.constant 0 : index
    %4 = vector.load %arg3[%c0_2, %c0_3, %c0_4] : memref<1x128x128xf32, #tpu.memory_space<vmem>>, vector<1x128x128xf32>
    %5 = vector.shape_cast %4 : vector<1x128x128xf32> to vector<128x128xf32>
    %c0_5 = arith.constant 0 : index
    %c0_6 = arith.constant 0 : index
    %c0_7 = arith.constant 0 : index
    %6 = vector.load %arg4[%c0_5, %c0_6, %c0_7] : memref<1x128x128xf32, #tpu.memory_space<vmem>>, vector<1x128x128xf32>
    %7 = vector.shape_cast %6 : vector<1x128x128xf32> to vector<128x128xf32>
    %cst = arith.constant dense<0.000000e+00> : vector<128x128xf32>
    %8 = tpu.matmul %5, %7, %cst {dimension_numbers = #tpu.dot_dimension_numbers<[1], [0], [0], [1], [0, 0, 1, 1], [], []>} : vector<128x128xf32>, vector<128x128xf32>, vector<128x128xf32> -> vector<128x128xf32>
    %9 = arith.addf %3, %8 : vector<128x128xf32>
    %c0_8 = arith.constant 0 : index
    %c0_9 = arith.constant 0 : index
    %10 = vector.load %arg7[%c0_8, %c0_9] : memref<128x128xf32, #tpu.memory_space<vmem>>, vector<128x128xf32>
    tpu.vector_store %arg7[%c0_8, %c0_9], %9 {strides = array<i32>} : memref<128x128xf32, #tpu.memory_space<vmem>>, vector<128x128xf32>,
    %c0_i32_10 = arith.constant 0 : i32
    %11 = arith.cmpi eq, %arg2, %c0_i32_10 : i32
    %12 = arith.extui %11 : i1 to i32
    %c0_i32_11 = arith.constant 0 : i32
    %13 = arith.cmpi ne, %12, %c0_i32_11 : i32
    scf.if %13 {
      %c0_12 = arith.constant 0 : index
      %c0_13 = arith.constant 0 : index
      %14 = vector.load %arg7[%c0_12, %c0_13] : memref<128x128xf32, #tpu.memory_space<vmem>>, vector<128x128xf32>
      %c0_14 = arith.constant 0 : index
      %c0_15 = arith.constant 0 : index
      %15 = vector.load %arg5[%c0_14, %c0_15] : memref<128x128xf32, #tpu.memory_space<vmem>>, vector<128x128xf32>
      %cst_16 = arith.constant dense<0.000000e+00> : vector<128x128xf32>
      %16 = tpu.matmul %14, %15, %cst_16 {dimension_numbers = #tpu.dot_dimension_numbers<[1], [0], [0], [1], [0, 0, 1, 1], [], []>} : vector<128x128xf32>, vector<128x128xf32>, vector<128x128xf32> -> vector<128x128xf32>
      %c0_17 = arith.constant 0 : index
      %c0_18 = arith.constant 0 : index
      %c0_19 = arith.constant 0 : index
      %17 = vector.load %arg6[%c0_17, %c0_18, %c0_19] : memref<1x128x128xf32, #tpu.memory_space<vmem>>, vector<1x128x128xf32>
      %18 = vector.shape_cast %17 : vector<1x128x128xf32> to vector<128x128xf32>
      %19 = vector.shape_cast %16 : vector<128x128xf32> to vector<1x128x128xf32>
      tpu.vector_store %arg6[%c0_17, %c0_18, %c0_19], %19 {strides = array<i32>} : memref<1x128x128xf32, #tpu.memory_space<vmem>>, vector<1x128x128xf32>,
    } else {
    }
    return
  }
  func.func @transform_0(%arg0: i32, %arg1: i32, %arg2: i32) -> (i32, i32, i32) {
    %c0_i32 = arith.constant 0 : i32
    return %arg0, %arg1, %arg2 : i32, i32, i32
  }
  func.func @transform_1(%arg0: i32, %arg1: i32, %arg2: i32) -> (i32, i32, i32) {
    %c0_i32 = arith.constant 0 : i32
    %c0_i32_0 = arith.constant 0 : i32
    return %arg0, %arg2, %c0_i32 : i32, i32, i32
  }
  func.func @transform_2(%arg0: i32, %arg1: i32, %arg2: i32) -> (i32, i32) {
    %c0_i32 = arith.constant 0 : i32
    %c0_i32_0 = arith.constant 0 : i32
    %c0_i32_1 = arith.constant 0 : i32
    return %c0_i32, %c0_i32_0 : i32, i32
  }
  func.func @transform_3(%arg0: i32, %arg1: i32, %arg2: i32) -> (i32, i32, i32) {
    %c0_i32 = arith.constant 0 : i32
    %c0_i32_0 = arith.constant 0 : i32
    return %arg0, %arg1, %c0_i32 : i32, i32, i32
  }
}

</mosaic_0001>

<bundles_post_ra>
// kernel: tpu_custom_call.1
= control target key start
LH: loop header
LB: loop body
LE: loop exit
PB: predicated region body
PF: predicated region fallthrough
CT: control target
= control target key end

     0   :  { %s1741_s0 = inlined_call_operand.hbm [shape: f32[2,128,128], index: 0, kind: input, shape index: {}]   ;;  %s1742_s1 = inlined_call_operand.hbm [shape: f32[2,128,128], index: 1, kind: input, shape index: {}]   ;;  %s1743_s2 = inlined_call_operand.hbm [shape: f32[128,128], index: 2, kind: input, shape index: {}]   ;;  %s1744_s3 = inlined_call_operand.hbm [shape: f32[2,128,128], index: 3, kind: output, shape index: {}]  }
   0x1   :  { %1752 = sst [smem:[#allocation14_spill]] %s1741_s0 }
   0x2   :  { %1753 = sst [smem:[#allocation15_spill]] %s1743_s2 }
   0x3   :  { %8 = vsyncpa [#allocation4], 0 }
   0x4   :  { %10 = vsyncpa [#allocation4 + $0x1], 0 }
   0x5   :  { %11 = vsyncpa [#allocation7], 0 }
   0x6   :  { %13 = vsyncpa [#allocation7 + $0x1], 0 }
   0x7   :  { %14 = vsyncpa [#allocation5], 0 }
   0x8   :  { %16 = vsyncpa [#allocation5 + $0x1], 0  ;;  %s1415_s12 = smov 0   ;;  %s1417_s13 = smov 0  }
   0x9   :  { %s1419_s14 = smov 0   ;;  %s1421_s15 = smov 0  }
   0xa   :  { %s1423_s16 = smov 0   ;;  %s1425_s17 = smov 0  }
   0xb LB: > { %s1446_s18 = sadd.s32 4294967295, %s1385_s17   ;;  %s862_s19 = sadd.s32 4294967294, %s1385_s17   ;;  %s1385_s17 = sphi %s1425_s17, %s22_s17   ;;  %s1381_s16 = sphi %s1423_s16, %s1776_s16   ;;  %s1377_s15 = sphi %s1421_s15, %s1775_s15   ;;  %s1373_s14 = sphi %s1419_s14, %s1774_s14   ;;  %s1369_s13 = sphi %s1417_s13, %s1773_s13   ;;  %s1365_s12 = sphi %s1415_s12, %s1772_s12  }
   0xc   : > { %p65_p0 = scmp.ne.s32.totalorder %s1369_s13, %s1365_s12  ;;  %p1745_p1 = scmp.eq.s32.totalorder %s1446_s18, 0 }
   0xd   : > { %p146_p3 = scmp.eq.s32.totalorder %s862_s19, 1  ;;  %p863_p5 = scmp.ge.s32.totalorder %s1385_s17, 1 }
   0xe   : > { %p1455_p4 = por %p1745_p1, %p65_p0  ;;  %p153_p7 = scmp.lt.s32.totalorder %s1385_s17, 3 }
   0xf   : > { %p1460_p6 = por %p146_p3, %p65_p0  ;;  %s1387_s23 = smov [#allocation8]  }
  0x10   : > { %s1754_s20 = scalar_select %p1455_p4, 1, 0 }
  0x11   : > { %s1755_s21 = scalar_select %p1460_p6, 1, 0 }
  0x12   : > { %p1465_p8 = pnand %p863_p5, %p153_p7  ;;  %s165_s24 = sshll.u32 %s1387_s23, 4  ;;  %s166_s24 = int_to_ptr.vmem [resolvable:$true] %s165_s24 }
  0x13   : > { %s41_s26 = sadd.s32 1, %s1381_s16  ;;  %s1758_s2 = sld [smem:[#allocation15_spill]] }
  0x14   : > { %s1756_s22 = scalar_select %p1465_p8, 1, 0 }
  0x15   : > { %p1135_p9 = pneg %p1465_p8 }
  0x17   : > { %p1474_p11 = pnand %p1135_p9, %p1745_p1 }
  0x19   : > { %s1207_s29 = scalar_lea.hbm %s1758_s2, 2048  ;;  %p1209_p13 = pneg %p1474_p11 }
  0x1a   : > { %p1208_p12 = scmp.ne.s32.totalorder %s1758_s2, %s1207_s29  ;;  %p1214_p5 = scmp.lt.u32.totalorder %s1207_s29, %s1758_s2 }
  0x1c   : > { %p1210_p0 = pnand %p1209_p13, %p1208_p12 }
  0x1e   : > { %p1211_p3 = pneg %p1210_p0 }
  0x20   : > { %p1216_p7 = pnand %p1214_p5, %p1211_p3 }
  0x22   : > { %1219 = shalt.err (!%p1216_p7)
}
  0x23   : > { %s1220_s7 = scalar_lea.vmem %s166_s24, 2048  ;;  %p1228_p2 = scmp.lt.s32.totalorder %s166_s24, %s166_s24 }
  0x24   : > { %p1221_p9 = scmp.ne.s32.totalorder %s166_s24, %s1220_s7  ;;  %p1229_p6 = scmp.lt.s32.totalorder %s1220_s7, %s1220_s7 }
  0x26   : > { %p1223_p10 = pnand %p1221_p9, %p1209_p13  ;;  %p1230_p4 = por %p1229_p6, %p1228_p2 }
  0x28   : > { %p1224_p1 = pneg %p1223_p10 }
  0x2a   : > { %p1231_p8 = pnand %p1230_p4, %p1224_p1 }
  0x2c   : > { %1234 = shalt.err (!%p1231_p8)
}
  0x2d   : > { %s1748_s8 = smov 128   ;;  %s1750_s9 = smov 8  }
  0x2e   : > { %1138 = dma.hbm_to_vmem [thread:$0]  (!%p1474_p11), %s1758_s2, 2048, %s166_s24, [#allocation7], %s1748_s8, %s1748_s8, %s1750_s9  }
  0x2f   : > { %p43_p1 = scmp.ge.s32.totalorder %s41_s26, 2  ;;  %s52_s19 = sadd.s32 1, %s1373_s14 }
  0x30   : > { %p59_p2 = scmp.ne.s32.totalorder %s1373_s14, %s1369_s13  ;;  %p60_p4 = scmp.eq.s32.totalorder %s1385_s17, 0 }
  0x31   : > { %s1778_s26 = smov (%p43_p1, %s41_s26), 0  ;;  %p1760_p8 = scmp.eq.s32.totalorder %s1446_s18, 1 }
  0x32   : > { %p1504_p6 = por %p60_p4, %p59_p2  ;;  %s45_s27 = ssub.s32 %s1381_s16, %s1778_s26 }
  0x33   : > { %p1510_p10 = por %p1760_p8, %p59_p2  ;;  %p1151_p12 = scmp.lt.s32.totalorder %s1385_s17, 2 }
  0x34   : > { %p50_p11 = scmp.eq.s32.totalorder %s45_s27, 0  ;;  %s179_s24 = sand.u32 1, %s1373_s14  }
  0x35   : > { %s866_s28 = sshll.u32 %s179_s24, 7  ;;  %s882_s30 = sshll.u32 %s1381_s16, 11 }
  0x36   : > { %s1519_s29 = scalar_select %p50_p11, %s1373_s14, %s52_s19  }
  0x37   : > { %s1762_s0 = sld [smem:[#allocation14_spill]]  ;;  %s183_s7 = scalar_lea.vmem [#allocation3], %s866_s28 }
  0x38   : > { %s193_s10 = sshll.u32 %s183_s7, 4  ;;  %p1531_p13 = pnand %p1151_p12, %p1504_p6  ;;  %s1527_s10 = int_to_ptr.vmem [resolvable:$true] %s193_s10 }
  0x39   : > { %s1538_s4 = scalar_lea.hbm %s1742_s1, %s882_s30  ;;  %s207_s5 = scalar_lea.vmem [#allocation6], %s866_s28 }
  0x3a   : > { %s1540_s8 = sshll.u32 %s207_s5, 4  ;;  %s1542_s9 = scalar_lea.sflag [#allocation4], %s179_s24  ;;  %s1574_s8 = int_to_ptr.vmem [resolvable:$true] %s1540_s8 }
  0x3b   : > { %p1237_p3 = pneg %p1531_p13 }
  0x3d   : > { %s1525_s6 = scalar_lea.hbm %s1762_s0, %s882_s30  ;;  %s1240_s19 = scalar_lea.hbm %s1762_s0, 4096 }
  0x3e   : > { %s1235_s7 = scalar_lea.hbm %s1525_s6, 2048  ;;  %p1241_p9 = scmp.lt.u32.totalorder %s1525_s6, %s1762_s0 }
  0x3f   : > { %p1236_p0 = scmp.ne.s32.totalorder %s1525_s6, %s1235_s7  ;;  %p1242_p1 = scmp.lt.u32.totalorder %s1240_s19, %s1235_s7 }
  0x40   : > { %p1244_p4 = scmp.lt.u32.totalorder %s1235_s7, %s1525_s6 }
  0x41   : > { %p1238_p5 = pnand %p1237_p3, %p1236_p0  ;;  %p1243_p2 = por %p1242_p1, %p1241_p9 }
  0x43   : > { %p1239_p7 = pneg %p1238_p5  ;;  %p1245_p6 = por %p1244_p4, %p1243_p2 }
  0x45   : > { %p1246_p8 = pnand %p1245_p6, %p1239_p7 }
  0x47   : > { %1249 = shalt.err (!%p1246_p8)
}
  0x48   : > { %s1250_s24 = scalar_lea.vmem %s1527_s10, 2048  ;;  %s1390_s2 = smov [#allocation3]  }
  0x49   : > { %p1251_p12 = scmp.ne.s32.totalorder %s1527_s10, %s1250_s24  ;;  %s1255_s28 = sshll.u32 %s1390_s2, 4  ;;  %s1256_s28 = int_to_ptr.vmem [resolvable:$false] %s1255_s28 }
  0x4a   : > { %s1257_s5 = scalar_lea.vmem %s1256_s28, 4096  ;;  %p1258_p5 = scmp.lt.s32.totalorder %s1527_s10, %s1256_s28 }
  0x4b   : > { %p1253_p11 = pnand %p1251_p12, %p1237_p3  ;;  %p1259_p9 = scmp.lt.s32.totalorder %s1257_s5, %s1250_s24 }
  0x4d   : > { %p1254_p0 = pneg %p1253_p11  ;;  %p1260_p1 = por %p1259_p9, %p1258_p5 }
  0x4f   : > { %p1261_p2 = pnand %p1260_p1, %p1254_p0 }
  0x51   : > { %1264 = shalt.err (!%p1261_p2)
}
  0x52   : > { %s1764_s7 = smov 8   ;;  %s1765_s23 = smov 128  }
  0x53   : > { %1142 = dma.hbm_to_vmem [thread:$0]  (!%p1531_p13), %s1525_s6, 2048, %s1527_s10, %s1542_s9, %s1765_s23, %s1765_s23, %s1764_s7  }
  0x54   : > { %s203_s19 = sand.u32 1, %s1385_s17   ;;  %s1265_s30 = scalar_lea.hbm %s1538_s4, 2048 }
  0x55   : > { %s1577_s27 = scalar_lea.sflag [#allocation7], %s203_s19  ;;  %p1266_p7 = scmp.ne.s32.totalorder %s1538_s4, %s1265_s30 }
  0x56   : > { %s1270_s28 = scalar_lea.hbm %s1742_s1, 4096  ;;  %p1271_p8 = scmp.lt.u32.totalorder %s1538_s4, %s1742_s1 }
  0x57   : > { %p1268_p4 = pnand %p1266_p7, %p1237_p3  ;;  %p1272_p12 = scmp.lt.u32.totalorder %s1270_s28, %s1265_s30 }
  0x58   : > { %p1274_p0 = scmp.lt.u32.totalorder %s1265_s30, %s1538_s4 }
  0x59   : > { %p1269_p6 = pneg %p1268_p4  ;;  %p1273_p11 = por %p1272_p12, %p1271_p8 }
  0x5b   : > { %p1275_p5 = por %p1274_p0, %p1273_p11 }
  0x5d   : > { %p1276_p9 = pnand %p1275_p5, %p1269_p6 }
  0x5f   : > { %1279 = shalt.err (!%p1276_p9)
}
  0x60   : > { %s1280_s9 = scalar_lea.vmem %s1574_s8, 2048  ;;  %s1391_s6 = smov [#allocation6]  }
  0x61   : > { %p1281_p1 = scmp.ne.s32.totalorder %s1574_s8, %s1280_s9  ;;  %s1285_s10 = sshll.u32 %s1391_s6, 4  ;;  %s1286_s10 = int_to_ptr.vmem [resolvable:$false] %s1285_s10 }
  0x62   : > { %s1287_s0 = scalar_lea.vmem %s1286_s10, 4096  ;;  %p1288_p4 = scmp.lt.s32.totalorder %s1574_s8, %s1286_s10 }
  0x63   : > { %p1283_p2 = pnand %p1281_p1, %p1237_p3  ;;  %p1289_p8 = scmp.lt.s32.totalorder %s1287_s0, %s1280_s9 }
  0x65   : > { %p1284_p7 = pneg %p1283_p2  ;;  %p1290_p12 = por %p1289_p8, %p1288_p4 }
  0x67   : > { %p1291_p11 = pnand %p1290_p12, %p1284_p7 }
  0x69   : > { %1294 = shalt.err (!%p1291_p11)
}
  0x6a   : > { %1145 = dma.hbm_to_vmem [thread:$0]  (!%p1531_p13), %s1538_s4, 2048, %s1574_s8, %s1577_s27, %s1765_s23, %s1765_s23, %s1764_s7  }
  0x6b   : > { %p1766_p3 = scmp.ne.s32.totalorder %s1756_s22, 0 }
  0x6c   : > { %s1609_s19 = sand.u32 (!%p1766_p3), 1, %s1369_s13   ;;  %p1767_p6 = scmp.ne.s32.totalorder (!%p1766_p3), %s1754_s20, 0 }
  0x6d   : > { %228 = sbr.rel (%p1766_p3) target bundleno = 628 (0x274), region = 32  ;;  %s1612_s30 = sshll.u32 (!%p1766_p3), %s1609_s19, 7 }
  0x6e   : > { %s231_s11 = scalar_lea.sflag (!%p1766_p3), [#allocation4], %s1609_s19  ;;  %s1616_s24 = scalar_lea.vmem (!%p1766_p3), [#allocation3], %s1612_s30 }
  0x74   : > { %1348 = dma.done.wait (%p1767_p6), %s231_s11, 2048  }
  0x75   : > { %1350 = vsyncadd (%p1767_p6), %s231_s11, 4294965248  ;;  %s239_s22 = sand.u32 1, %s1446_s18   ;;  %s1624_s4 = scalar_lea.vmem [#allocation6], %s1612_s30 }
  0x76   : > { %s240_s8 = scalar_lea.sflag [#allocation7], %s239_s22 }
  0x77   : > { %1352 = dma.done.wait (%p1767_p6), %s240_s8, 2048  }
  0x78   : > { %1354 = vsyncadd (%p1767_p6), %s240_s8, 4294965248  ;;  %p1768_p13 = scmp.eq.s32.totalorder %s1446_s18, 0 }
  0x7a   : > { %1356 = dma.done.wait (%p1768_p13), [#allocation7], 2048   ;;  %p1769_p0 = pmov %p1768_p13 }
  0x7b   : > { %v330_v0 = vld [vmem:[%s1624_s4] sm:$0xff]  ;;  %v331_v1 = vld [vmem:[%s1624_s4 + $0x8] sm:$0xff]  ;;  %v332_v2 = vld [vmem:[%s1624_s4 + $0x10] sm:$0xff]  ;;  %s1667_s18 = scalar_lea.vmem [#allocation9], %s1612_s30  ;;  %s884_s20 = sshll.u32 %s1377_s15, 11 }
  0x7c   : > { %1358 = vsyncadd (%p1769_p0), [#allocation7], 4294965248  ;;  %v1061_v3 = vpack.c.bf16 %v331_v1, %v330_v0  ;;  %v333_v4 = vld [vmem:[%s1624_s4 + $0x18] sm:$0xff]  ;;  %v334_v6 = vld [vmem:[%s1624_s4 + $0x20] sm:$0xff]  ;;  %s735_s7 = sshll.u32 %s1667_s18, 4  ;;  %s1688_s2 = scalar_lea.hbm %s1744_s3, %s884_s20  ;;  %s1690_s7 = int_to_ptr.vmem [resolvable:$true] %s735_s7 }
  0x7d   : > { %v1065_v5 = vpack.c.bf16 %v333_v4, %v332_v2  ;;  %v335_v7 = vld [vmem:[%s1624_s4 + $0x28] sm:$0xff]  ;;  %v314_v9 = vld [vmem:[%s1616_s24] sm:$0xff]  ;;  %v336_v10 = vld [vmem:[%s1624_s4 + $0x30] sm:$0xff]  ;;  %s720_s28 = scalar_lea.sflag [#allocation5], %s1609_s19  ;;  %s1295_s15 = scalar_lea.vmem %s1690_s7, 2048 }
  0x7e   : > { %1062 = vmatprep.subr.bf16.mxu0 %v1061_v3  ;;  %v1069_v8 = vpack.c.bf16 %v335_v7, %v334_v6  ;;  %v337_v11 = vld [vmem:[%s1624_s4 + $0x38] sm:$0xff]  ;;  %981 = vmatprep.mubr.f32.mxu0 %v314_v9  ;;  %v338_v13 = vld [vmem:[%s1624_s4 + $0x40] sm:$0xff]  ;;  %v339_v14 = vld [vmem:[%s1624_s4 + $0x48] sm:$0xff]  ;;  %p1296_p5 = scmp.ne.s32.totalorder %s1690_s7, %s1295_s15  ;;  %s1392_s5 = smov [#allocation9]  }
  0x7f   : > { %1064 = vmatpush3.bf16.msra.mxu0 %v1061_v3  ;;  %v1073_v12 = vpack.c.bf16 %v337_v11, %v336_v10  ;;  %v542_v15 = vld [vmem:[#allocation8] sm:$0xff]  ;;  %v543_v16 = vld [vmem:[#allocation8 + $0x8] sm:$0xff]  ;;  %v544_v17 = vld [vmem:[#allocation8 + $0x10] sm:$0xff]  ;;  %v1077_v21 = vpack.c.bf16 %v339_v14, %v338_v13  ;;  %s1299_s9 = sshll.u32 %s1392_s5, 4  ;;  %s1300_s9 = int_to_ptr.vmem [resolvable:$false] %s1299_s9 }
  0x80   : > { %1066 = vmatprep.subr.bf16.mxu0 %v1065_v5  ;;  %v545_v18 = vld [vmem:[#allocation8 + $0x18] sm:$0xff]  ;;  %v1093_v19 = vpack.c.bf16 %v543_v16, %v542_v15  ;;  %v546_v22 = vld [vmem:[#allocation8 + $0x20] sm:$0xff]  ;;  %v547_v23 = vld [vmem:[#allocation8 + $0x28] sm:$0xff]  ;;  %p1297_p9 = pnand %p1296_p5, %p1510_p10  ;;  %s1301_s6 = scalar_lea.vmem %s1300_s9, 4096 }
  0x81   : > { %v1097_v20 = vpack.c.bf16 %v545_v18, %v544_v17  ;;  %v340_v24 = vld [vmem:[%s1624_s4 + $0x50] sm:$0xff]  ;;  %v341_v25 = vld [vmem:[%s1624_s4 + $0x58] sm:$0xff]  ;;  %v1101_v26 = vpack.c.bf16 %v547_v23, %v546_v22  ;;  %v342_v30 = vld [vmem:[%s1624_s4 + $0x60] sm:$0xff]  ;;  %p1302_p2 = scmp.lt.s32.totalorder %s1690_s7, %s1300_s9  ;;  %p1303_p7 = scmp.lt.s32.totalorder %s1301_s6, %s1295_s15 }
  0x82   : > { %1094 = vmatprep.subr.bf16.mxu1 %v1093_v19  ;;  %v1081_v27 = vpack.c.bf16 %v341_v25, %v340_v24  ;;  %v548_v28 = vld [vmem:[#allocation8 + $0x30] sm:$0xff]  ;;  %v549_v29 = vld [vmem:[#allocation8 + $0x38] sm:$0xff]  ;;  %v343_v31 = vld [vmem:[%s1624_s4 + $0x68] sm:$0xff]  ;;  %p1298_p1 = pneg %p1297_p9 }
  0x83   : > { %1068 = vmatpush3.bf16.msra.mxu0 %v1065_v5  ;;  %1096 = vmatpush3.bf16.msra.mxu1 %v1093_v19  ;;  %v1105_v32 = vpack.c.bf16 %v549_v29, %v548_v28  ;;  %v1085_v33 = vpack.c.bf16 %v343_v31, %v342_v30  ;;  %v550_v34 = vld [vmem:[#allocation8 + $0x40] sm:$0xff]  ;;  %v551_v35 = vld [vmem:[#allocation8 + $0x48] sm:$0xff]  ;;  %v344_v36 = vld [vmem:[%s1624_s4 + $0x70] sm:$0xff]  ;;  %p1304_p4 = por %p1303_p7, %p1302_p2 }
  0x84   : > { %1070 = vmatprep.subr.bf16.mxu0 %v1069_v8  ;;  %1098 = vmatprep.subr.bf16.mxu1 %v1097_v20  ;;  %v345_v37 = vld [vmem:[%s1624_s4 + $0x78] sm:$0xff]  ;;  %v1109_v38 = vpack.c.bf16 %v551_v35, %v550_v34  ;;  %v552_v40 = vld [vmem:[#allocation8 + $0x50] sm:$0xff]  ;;  %v554_v43 = vld [vmem:[#allocation8 + $0x60] sm:$0xff] }
  0x85   : > { %v1089_v39 = vpack.c.bf16 %v345_v37, %v344_v36  ;;  %v553_v41 = vld [vmem:[#allocation8 + $0x58] sm:$0xff]  ;;  %v555_v44 = vld [vmem:[#allocation8 + $0x68] sm:$0xff]  ;;  %v316_v47 = vld [vmem:[%s1616_s24 + $0x10] sm:$0xff]  ;;  %p1305_p8 = pnand %p1304_p4, %p1298_p1 }
  0x86   : > { %v1113_v42 = vpack.c.bf16 %v553_v41, %v552_v40  ;;  %v315_v45 = vld [vmem:[%s1616_s24 + $0x8] sm:$0xff]  ;;  %v1117_v46 = vpack.c.bf16 %v555_v44, %v554_v43  ;;  %v556_v48 = vld [vmem:[#allocation8 + $0x70] sm:$0xff]  ;;  %v557_v49 = vld [vmem:[#allocation8 + $0x78] sm:$0xff] }
  0x87   : > { %1072 = vmatpush3.bf16.msra.mxu0 %v1069_v8  ;;  %1100 = vmatpush3.bf16.msra.mxu1 %v1097_v20  ;;  %v317_v50 = vld [vmem:[%s1616_s24 + $0x18] sm:$0xff]  ;;  %v1121_v51 = vpack.c.bf16 %v557_v49, %v556_v48  ;;  %v318_v52 = vld [vmem:[%s1616_s24 + $0x20] sm:$0xff]  ;;  %v319_v53 = vld [vmem:[%s1616_s24 + $0x28] sm:$0xff] }
  0x88   : > { %1074 = vmatprep.subr.bf16.mxu0 %v1073_v12  ;;  %1102 = vmatprep.subr.bf16.mxu1 %v1101_v26  ;;  %v320_v54 = vld [vmem:[%s1616_s24 + $0x30] sm:$0xff]  ;;  %v321_v55 = vld [vmem:[%s1616_s24 + $0x38] sm:$0xff]  ;;  %v322_v56 = vld [vmem:[%s1616_s24 + $0x40] sm:$0xff] }
  0x89   : > { %v323_v57 = vld [vmem:[%s1616_s24 + $0x48] sm:$0xff]  ;;  %v324_v58 = vld [vmem:[%s1616_s24 + $0x50] sm:$0xff]  ;;  %v325_v59 = vld [vmem:[%s1616_s24 + $0x58] sm:$0xff] }
  0x8a   : > { %v326_v60 = vld [vmem:[%s1616_s24 + $0x60] sm:$0xff]  ;;  %v327_v61 = vld [vmem:[%s1616_s24 + $0x68] sm:$0xff]  ;;  %v328_v62 = vld [vmem:[%s1616_s24 + $0x70] sm:$0xff] }
  0x8b   : > { %1076 = vmatpush3.bf16.msra.mxu0 %v1073_v12  ;;  %1104 = vmatpush3.bf16.msra.mxu1 %v1101_v26  ;;  %v329_v63 = vld [vmem:[%s1616_s24 + $0x78] sm:$0xff] }
  0x8c   : > { %1078 = vmatprep.subr.bf16.mxu0 %v1077_v21  ;;  %1106 = vmatprep.subr.bf16.mxu1 %v1105_v32 }
  0x8f   : > { %1080 = vmatpush3.bf16.msra.mxu0 %v1077_v21  ;;  %1108 = vmatpush3.bf16.msra.mxu1 %v1105_v32 }
  0x90   : > { %1082 = vmatprep.subr.bf16.mxu0 %v1081_v27  ;;  %1110 = vmatprep.subr.bf16.mxu1 %v1109_v38 }
  0x93   : > { %1084 = vmatpush3.bf16.msra.mxu0 %v1081_v27  ;;  %1112 = vmatpush3.bf16.msra.mxu1 %v1109_v38 }
  0x94   : > { %1086 = vmatprep.subr.bf16.mxu0 %v1085_v33  ;;  %1114 = vmatprep.subr.bf16.mxu1 %v1113_v42 }
  0x97   : > { %1088 = vmatpush3.bf16.msra.mxu0 %v1085_v33  ;;  %1116 = vmatpush3.bf16.msra.mxu1 %v1113_v42 }
  0x98   : > { %1090 = vmatprep.subr.bf16.mxu0 %v1089_v39  ;;  %1118 = vmatprep.subr.bf16.mxu1 %v1117_v46 }
  0x9b   : > { %1092 = vmatpush3.bf16.msra.mxu0 %v1089_v39  ;;  %1120 = vmatpush3.bf16.msra.mxu1 %v1117_v46 }
  0x9c   : > { %1122 = vmatprep.subr.bf16.mxu1 %v1121_v51 }
  0x9e   : > { %982 = vmatmul.mubr.f32.vlgmr.msra.gmra.mrb[0].mxu0 %v315_v45 }
  0x9f   : > { %984 = vmatprep.mubr.f32.mxu0 %v316_v47  ;;  %1124 = vmatpush3.bf16.msra.mxu1 %v1121_v51 }
  0xa2   : > { %985 = vmatmul.mubr.f32.gmra.mrb[2].mxu0 %v317_v50 }
  0xa3   : > { %987 = vmatprep.mubr.f32.mxu0 %v318_v52 }
  0xa6   : > { %988 = vmatmul.mubr.f32.gmra.mrb[4].mxu0 %v319_v53 }
  0xa7   : > { %990 = vmatprep.mubr.f32.mxu0 %v320_v54 }
  0xaa   : > { %991 = vmatmul.mubr.f32.gmra.mrb[6].mxu0 %v321_v55 }
  0xab   : > { %993 = vmatprep.mubr.f32.mxu0 %v322_v56 }
  0xae   : > { %994 = vmatmul.mubr.f32.gmra.mrb[8].mxu0 %v323_v57 }
  0xaf   : > { %996 = vmatprep.mubr.f32.mxu0 %v324_v58 }
  0xb2   : > { %997 = vmatmul.mubr.f32.gmra.mrb[10].mxu0 %v325_v59 }
  0xb3   : > { %999 = vmatprep.mubr.f32.mxu0 %v326_v60 }
  0xb6   : > { %1000 = vmatmul.mubr.f32.gmra.mrb[12].mxu0 %v327_v61 }
  0xb7   : > { %1002 = vmatprep.mubr.f32.mxu0 %v328_v62 }
  0xba   : > { %1003 = vmatmul.mubr.f32.gmra.mrb[14].mxu0 %v329_v63 }
 0x171   : > { %v983_v0 = vpop.f32.mrb[0].mxu0 }
 0x172   : > { %v412_v1 = vpop.f32.mrb[1].mxu0 }
 0x173   : > { %1037 = vmatprep.mubr.f32.mxu1 %v412_v1 }
 0x174   : > { %1038 = vmatmul.mubr.f32.vlgmr.msra.gmra.mrb[0].mxu1 %v983_v0 }
 0x175   : > { %v986_v2 = vpop.f32.mrb[2].mxu0 }
 0x176   : > { %v422_v3 = vpop.f32.mrb[3].mxu0 }
 0x177   : > { %1040 = vmatprep.mubr.f32.mxu1 %v422_v3 }
 0x178   : > { %1041 = vmatmul.mubr.f32.gmra.mrb[2].mxu1 %v986_v2 }
 0x179   : > { %v989_v4 = vpop.f32.mrb[4].mxu0 }
 0x17a   : > { %v432_v5 = vpop.f32.mrb[5].mxu0 }
 0x17b   : > { %1043 = vmatprep.mubr.f32.mxu1 %v432_v5 }
 0x17c   : > { %1044 = vmatmul.mubr.f32.gmra.mrb[4].mxu1 %v989_v4 }
 0x17d   : > { %v992_v6 = vpop.f32.mrb[6].mxu0 }
 0x17e   : > { %v442_v7 = vpop.f32.mrb[7].mxu0 }
 0x17f   : > { %1046 = vmatprep.mubr.f32.mxu1 %v442_v7 }
 0x180   : > { %1047 = vmatmul.mubr.f32.gmra.mrb[6].mxu1 %v992_v6 }
 0x181   : > { %v995_v8 = vpop.f32.mrb[8].mxu0 }
 0x182   : > { %v452_v9 = vpop.f32.mrb[9].mxu0 }
 0x183   : > { %1049 = vmatprep.mubr.f32.mxu1 %v452_v9 }
 0x184   : > { %1050 = vmatmul.mubr.f32.gmra.mrb[8].mxu1 %v995_v8 }
 0x185   : > { %v998_v10 = vpop.f32.mrb[10].mxu0 }
 0x186   : > { %v462_v11 = vpop.f32.mrb[11].mxu0 }
 0x187   : > { %1052 = vmatprep.mubr.f32.mxu1 %v462_v11 }
 0x188   : > { %1053 = vmatmul.mubr.f32.gmra.mrb[10].mxu1 %v998_v10 }
 0x189   : > { %v1001_v12 = vpop.f32.mrb[12].mxu0 }
 0x18a   : > { %v472_v13 = vpop.f32.mrb[13].mxu0 }
 0x18b   : > { %1055 = vmatprep.mubr.f32.mxu1 %v472_v13 }
 0x18c   : > { %1056 = vmatmul.mubr.f32.gmra.mrb[12].mxu1 %v1001_v12 }
 0x18d   : > { %v1004_v14 = vpop.f32.mrb[14].mxu0 }
 0x18e   : > { %v482_v15 = vpop.f32.mrb[15].mxu0 }
 0x18f   : > { %1058 = vmatprep.mubr.f32.mxu1 %v482_v15 }
 0x190   : > { %1059 = vmatmul.mubr.f32.gmra.mrb[14].mxu1 %v1004_v14 }
 0x247   : > { %v1039_v16 = vpop.f32.mrb[0].mxu1 }
 0x248   : > { %704 = vst [vmem:[%s1667_s18 + $0x8] sm:$0xff] %v1039_v16  ;;  %v624_v17 = vpop.f32.mrb[1].mxu1 }
 0x249   : > { %703 = vst [vmem:[%s1667_s18] sm:$0xff] %v624_v17 }
 0x24b   : > { %v1042_v18 = vpop.f32.mrb[2].mxu1 }
 0x24c   : > { %706 = vst [vmem:[%s1667_s18 + $0x18] sm:$0xff] %v1042_v18  ;;  %v634_v19 = vpop.f32.mrb[3].mxu1 }
 0x24d   : > { %705 = vst [vmem:[%s1667_s18 + $0x10] sm:$0xff] %v634_v19 }
 0x24f   : > { %v1045_v20 = vpop.f32.mrb[4].mxu1 }
 0x250   : > { %708 = vst [vmem:[%s1667_s18 + $0x28] sm:$0xff] %v1045_v20  ;;  %v644_v21 = vpop.f32.mrb[5].mxu1 }
 0x251   : > { %707 = vst [vmem:[%s1667_s18 + $0x20] sm:$0xff] %v644_v21 }
 0x253   : > { %v1048_v22 = vpop.f32.mrb[6].mxu1 }
 0x254   : > { %710 = vst [vmem:[%s1667_s18 + $0x38] sm:$0xff] %v1048_v22  ;;  %v654_v23 = vpop.f32.mrb[7].mxu1 }
 0x255   : > { %709 = vst [vmem:[%s1667_s18 + $0x30] sm:$0xff] %v654_v23 }
 0x257   : > { %v1051_v24 = vpop.f32.mrb[8].mxu1 }
 0x258   : > { %712 = vst [vmem:[%s1667_s18 + $0x48] sm:$0xff] %v1051_v24  ;;  %v664_v25 = vpop.f32.mrb[9].mxu1 }
 0x259   : > { %711 = vst [vmem:[%s1667_s18 + $0x40] sm:$0xff] %v664_v25 }
 0x25b   : > { %v1054_v26 = vpop.f32.mrb[10].mxu1 }
 0x25c   : > { %714 = vst [vmem:[%s1667_s18 + $0x58] sm:$0xff] %v1054_v26  ;;  %v674_v27 = vpop.f32.mrb[11].mxu1 }
 0x25d   : > { %713 = vst [vmem:[%s1667_s18 + $0x50] sm:$0xff] %v674_v27 }
 0x25f   : > { %v1057_v28 = vpop.f32.mrb[12].mxu1 }
 0x260   : > { %716 = vst [vmem:[%s1667_s18 + $0x68] sm:$0xff] %v1057_v28  ;;  %v684_v29 = vpop.f32.mrb[13].mxu1 }
 0x261   : > { %715 = vst [vmem:[%s1667_s18 + $0x60] sm:$0xff] %v684_v29 }
 0x263   : > { %v1060_v30 = vpop.f32.mrb[14].mxu1 }
 0x264   : > { %718 = vst [vmem:[%s1667_s18 + $0x78] sm:$0xff] %v1060_v30  ;;  %v694_v31 = vpop.f32.mrb[15].mxu1 }
 0x265   : > { %717 = vst [vmem:[%s1667_s18 + $0x70] sm:$0xff] %v694_v31 }
 0x266   : > { %1308 = shalt.err (!%p1305_p8)
}
 0x267   : > { %s1309_s10 = scalar_lea.hbm %s1688_s2, 2048  ;;  %s1313_s11 = scalar_lea.hbm %s1744_s3, 4096 }
 0x268   : > { %p1310_p12 = scmp.ne.s32.totalorder %s1688_s2, %s1309_s10  ;;  %p1314_p6 = scmp.lt.u32.totalorder %s1688_s2, %s1744_s3 }
 0x269   : > { %p1315_p13 = scmp.lt.u32.totalorder %s1313_s11, %s1309_s10  ;;  %p1317_p5 = scmp.lt.u32.totalorder %s1309_s10, %s1688_s2 }
 0x26a   : > { %p1311_p11 = pnand %p1310_p12, %p1510_p10 }
 0x26b   : > { %p1316_p0 = por %p1315_p13, %p1314_p6 }
 0x26c   : > { %p1312_p3 = pneg %p1311_p11 }
 0x26d   : > { %p1318_p9 = por %p1317_p5, %p1316_p0 }
 0x26f   : > { %p1319_p1 = pnand %p1318_p9, %p1312_p3 }
 0x271   : > { %1322 = shalt.err (!%p1319_p1)
}
 0x272   : > { %s1393_s8 = smov 128   ;;  %s1394_s4 = smov 8  }
 0x273   : > { %1133 = dma.vmem_to_hbm [thread:$0]  (%p1510_p10), %s1690_s7, 2048, %s1688_s2, %s720_s28, %s1393_s8, %s1393_s8, %s1394_s4  }
 0x274 PF: > { %s750_s18 = sand.u32 1, %s1365_s12   ;;  %p1770_p2 = scmp.ne.s32.totalorder %s1755_s21, 0 }
 0x275   : > { %p1771_p7 = scmp.ge.s32.totalorder %s1385_s17, 2  ;;  %s751_s20 = scalar_lea.sflag [#allocation5], %s750_s18 }
 0x277   : > { %p1147_p4 = pnand %p1771_p7, %p1770_p2 }
 0x279   : > { %1360 = dma.done.wait (!%p1147_p4), %s751_s20, 2048  }
 0x27a   : > { %1362 = vsyncadd (!%p1147_p4), %s751_s20, 4294965248  ;;  %s22_s17 = sadd.s32 1, %s1385_s17   ;;  %s1772_s12 = smov %s1369_s13 }
 0x27b   : > { %p19_p8 = scmp.ge.s32.totalorder %s22_s17, 4   ;;  %s1773_s13 = smov %s1373_s14 }
 0x27c   : > { %s1774_s14 = smov %s1519_s29  ;;  %s1775_s15 = smov %s1381_s16 }
 0x27d   : > { %s1776_s16 = smov %s1778_s26  ;;  %21 = sbr.rel (!%p19_p8) target bundleno = 11 (0xb), region = 102 }
 0x284   :  { %756 = vsyncpa [#allocation4], 1 }
 0x285   :  { %758 = vsyncpa [#allocation4 + $0x1], 1 }
 0x286   :  { %759 = vsyncpa [#allocation7], 1 }
 0x287   :  { %761 = vsyncpa [#allocation7 + $0x1], 1 }
 0x288   :  { %762 = vsyncpa [#allocation5], 1 }
 0x289   :  { %764 = vsyncpa [#allocation5 + $0x1], 1 }

</bundles_post_ra>
